<compile_context>
chip_gen: v5e
topology: v5e:2x2
jax: 0.10.0
libtpu: 0.0.40
codegen_flags: <defaults>
</compile_context>

<pallas_src>
import jax
import jax.numpy as jnp
from jax.experimental import pallas as pl
from jax.experimental.pallas import tpu as pltpu

# Padded (hardware-tile) dims for the default Policy(4, 150, 120, 2).
S_PAD = 128
H1_PAD = 256
H2_PAD = 128
A_PAD = 128
NEG_INF = -1e30  # padded-action logit bias -> ~0 probability after softmax
MAX_TILE_B = 512


def policy_kernel(x_ref, w1_ref, b1_ref, w2_ref, b2_ref, w3_ref, b3_ref, out_ref):
    # One batch tile per grid step; weights/biases are VMEM-resident blocks.
    x = x_ref[...]

    # fc1 + ReLU   (K=128, N=256 -> clean MXU tiles)
    h1 = jnp.dot(x, w1_ref[...], preferred_element_type=jnp.float32) + b1_ref[...]
    h1 = jnp.maximum(h1, 0.0)

    # fc2 + ReLU   (K=256, N=128)
    h2 = jnp.dot(h1, w2_ref[...], preferred_element_type=jnp.float32) + b2_ref[...]
    h2 = jnp.maximum(h2, 0.0)

    # final linear (K=128, N=128); padded action lanes carry bias -1e30.
    logits = jnp.dot(h2, w3_ref[...], preferred_element_type=jnp.float32) + b3_ref[...]

    # softmax over the (padded, lane-dense) action axis; padded lanes -> exp(-inf)=0.
    m = jnp.max(logits, axis=-1, keepdims=True)
    e = jnp.exp(logits - m)
    denom = jnp.sum(e, axis=-1, keepdims=True)
    out_ref[...] = e * pl.reciprocal(denom, approx=False)


def _pad2(a, rows, cols):
    return jnp.pad(a, ((0, rows - a.shape[0]), (0, cols - a.shape[1])))


def prepare_params(w1, b1, w2, b2, w3, b3):
    """Pad weights/biases to hardware tiles ONCE (outside the per-step hot path).

    Weights are stored (in_features, out_features) so the kernel computes x @ W.
    Padded rows/cols are zero; padded final-bias entries are -1e30 so the
    padded action lanes get ~0 probability mass in the in-kernel softmax.
    """
    w1p = _pad2(w1, S_PAD, H1_PAD)
    b1p = jnp.pad(b1, (0, H1_PAD - b1.shape[0])).reshape(1, H1_PAD)
    w2p = _pad2(w2, H1_PAD, H2_PAD)
    b2p = jnp.pad(b2, (0, H2_PAD - b2.shape[0])).reshape(1, H2_PAD)
    w3p = _pad2(w3, H2_PAD, A_PAD)
    b3p = jnp.pad(b3, (0, A_PAD - b3.shape[0]),
                  constant_values=NEG_INF).reshape(1, A_PAD)
    return (w1p.astype(jnp.float32), b1p.astype(jnp.float32),
            w2p.astype(jnp.float32), b2p.astype(jnp.float32),
            w3p.astype(jnp.float32), b3p.astype(jnp.float32))


def policy_forward(x, padded_params, a_size=2):
    """x: (B, s_size) float32 -> probs: (B, a_size) float32.

    Batch is tiled with a 1-D grid; weights use a constant block index so the
    pipeline keeps them VMEM-resident across all grid steps.
    """
    w1p, b1p, w2p, b2p, w3p, b3p = padded_params
    B, s_size = x.shape

    # Batch tile: amortize per-step overhead, cap for v7x's smaller VMEM.
    if B >= MAX_TILE_B:
        tile_b = MAX_TILE_B
    else:
        tile_b = max(8, ((B + 7) // 8) * 8)
    b_pad = ((B + tile_b - 1) // tile_b) * tile_b

    xp = jnp.pad(x.astype(jnp.float32),
                 ((0, b_pad - B), (0, S_PAD - s_size)))

    grid = (b_pad // tile_b,)
    out = pl.pallas_call(
        policy_kernel,
        out_shape=jax.ShapeDtypeStruct((b_pad, A_PAD), jnp.float32),
        grid=grid,
        in_specs=[
            pl.BlockSpec((tile_b, S_PAD), lambda i: (i, 0)),   # x: advances with i
            pl.BlockSpec((S_PAD, H1_PAD), lambda i: (0, 0)),   # weights: VMEM-resident
            pl.BlockSpec((1, H1_PAD), lambda i: (0, 0)),
            pl.BlockSpec((H1_PAD, H2_PAD), lambda i: (0, 0)),
            pl.BlockSpec((1, H2_PAD), lambda i: (0, 0)),
            pl.BlockSpec((H2_PAD, A_PAD), lambda i: (0, 0)),
            pl.BlockSpec((1, A_PAD), lambda i: (0, 0)),
        ],
        out_specs=pl.BlockSpec((tile_b, A_PAD), lambda i: (i, 0)),  # lane-dense 128
        compiler_params=pltpu.CompilerParams(
            dimension_semantics=("parallel",)),  # 2 TCs on v7x; no-op on v5e/v6e
    )(xp, w1p, b1p, w2p, b2p, w3p, b3p)

    return out[:B, :a_size]


def init_params(key, s_size=4, fc1_size=150, fc2_size=120, a_size=2):
    """Deterministic synthetic init (PyTorch-Linear-style uniform bounds)."""
    ks = jax.random.split(key, 6)

    def linear_init(kw, kb, fan_in, fan_out):
        bound = 1.0 / jnp.sqrt(fan_in)
        # stored as (in, out) so kernel does x @ W
        w = jax.random.uniform(kw, (fan_in, fan_out), jnp.float32, -bound, bound)
        b = jax.random.uniform(kb, (fan_out,), jnp.float32, -bound, bound)
        return w, b

    w1, b1 = linear_init(ks[0], ks[1], s_size, fc1_size)
    w2, b2 = linear_init(ks[2], ks[3], fc1_size, fc2_size)
    w3, b3 = linear_init(ks[4], ks[5], fc2_size, a_size)
    return w1, b1, w2, b2, w3, b3


def policy_forward_ref(x, w1, b1, w2, b2, w3, b3):
    h1 = jnp.maximum(x @ w1 + b1, 0.0)
    h2 = jnp.maximum(h1 @ w2 + b2, 0.0)
    logits = h2 @ w3 + b3
    return jax.nn.softmax(logits, axis=-1)


if __name__ == "__main__":
    key = jax.random.PRNGKey(0)
    k_params, k_x1, k_x2 = jax.random.split(key, 3)

    s_size, fc1_size, fc2_size, a_size = 4, 150, 120, 2
    params = init_params(k_params, s_size, fc1_size, fc2_size, a_size)
    padded = prepare_params(*params)  # pad once, outside the hot path

    # --- small batch (matches Policy.act-style usage) ---
    batch = 2
    x = jax.random.normal(k_x1, (batch, s_size), jnp.float32)
    probs = jax.block_until_ready(policy_forward(x, padded, a_size))
    ref = policy_forward_ref(x, *params)
    assert probs.shape == (batch, a_size)
    assert jnp.allclose(probs, ref, atol=1e-5, rtol=1e-5)
    assert jnp.allclose(jnp.sum(probs, axis=-1), 1.0, atol=1e-5)

    # --- large batch (amortized rollout path: multi-step batch grid + padding) ---
    big_batch = 1500  # -> tile_b=512, grid=(3,), batch padded to 1536
    xb = jax.random.normal(k_x2, (big_batch, s_size), jnp.float32)
    probs_b = jax.block_until_ready(policy_forward(xb, padded, a_size))
    ref_b = policy_forward_ref(xb, *params)
    assert probs_b.shape == (big_batch, a_size)
    assert jnp.allclose(probs_b, ref_b, atol=1e-5, rtol=1e-5)
    assert jnp.allclose(jnp.sum(probs_b, axis=-1), 1.0, atol=1e-5)

    # TODO(synk): Policy.act (Categorical sampling / log_prob) is host-side glue
    # in the original module and is not part of the kernel hot path.
    print("KERNEL_OK")
</pallas_src>

<mosaic_0001>
module attributes {stable_mosaic.version = 11 : i64} {
  func.func @policy_kernel(%arg0: i32, %arg1: memref<8x128xf32, #tpu.memory_space<vmem>>, %arg2: memref<128x256xf32, #tpu.memory_space<vmem>>, %arg3: memref<1x256xf32, #tpu.memory_space<vmem>>, %arg4: memref<256x128xf32, #tpu.memory_space<vmem>>, %arg5: memref<1x128xf32, #tpu.memory_space<vmem>>, %arg6: memref<128x128xf32, #tpu.memory_space<vmem>>, %arg7: memref<1x128xf32, #tpu.memory_space<vmem>>, %arg8: memref<8x128xf32, #tpu.memory_space<vmem>>) attributes {dimension_semantics = [#tpu.dimension_semantics<parallel>], iteration_bounds = array<i64: 1>, scalar_prefetch = 0 : i64, scratch_operands = 0 : i64, tpu.core_type = #tpu.core_type<tc>, window_params = [{transform_indices = @transform_0, window_bounds = array<i64: 8, 128>}, {pipeline_mode = #tpu.pipeline_mode<synchronous>, transform_indices = @transform_1, window_bounds = array<i64: 128, 256>}, {pipeline_mode = #tpu.pipeline_mode<synchronous>, transform_indices = @transform_2, window_bounds = array<i64: 1, 256>}, {pipeline_mode = #tpu.pipeline_mode<synchronous>, transform_indices = @transform_3, window_bounds = array<i64: 256, 128>}, {pipeline_mode = #tpu.pipeline_mode<synchronous>, transform_indices = @transform_4, window_bounds = array<i64: 1, 128>}, {pipeline_mode = #tpu.pipeline_mode<synchronous>, transform_indices = @transform_5, window_bounds = array<i64: 128, 128>}, {pipeline_mode = #tpu.pipeline_mode<synchronous>, transform_indices = @transform_6, window_bounds = array<i64: 1, 128>}, {transform_indices = @transform_7, window_bounds = array<i64: 8, 128>}]} {
    %c0 = arith.constant 0 : index
    %c0_0 = arith.constant 0 : index
    %0 = vector.load %arg1[%c0, %c0_0] : memref<8x128xf32, #tpu.memory_space<vmem>>, vector<8x128xf32>
    %c0_1 = arith.constant 0 : index
    %c0_2 = arith.constant 0 : index
    %1 = vector.load %arg2[%c0_1, %c0_2] : memref<128x256xf32, #tpu.memory_space<vmem>>, vector<128x256xf32>
    %cst = arith.constant dense<0.000000e+00> : vector<8x256xf32>
    %2 = tpu.matmul %0, %1, %cst {dimension_numbers = #tpu.dot_dimension_numbers<[1], [0], [0], [1], [0, 0, 1, 1], [], []>} : vector<8x128xf32>, vector<128x256xf32>, vector<8x256xf32> -> vector<8x256xf32>
    %c0_3 = arith.constant 0 : index
    %c0_4 = arith.constant 0 : index
    %3 = vector.load %arg3[%c0_3, %c0_4] : memref<1x256xf32, #tpu.memory_space<vmem>>, vector<1x256xf32>
    %4 = vector.broadcast %3 : vector<1x256xf32> to vector<8x256xf32>
    %5 = arith.addf %2, %4 : vector<8x256xf32>
    %cst_5 = arith.constant 0.000000e+00 : f32
    %6 = vector.broadcast %cst_5 : f32 to vector<8x256xf32>
    %7 = arith.maximumf %5, %6 : vector<8x256xf32>
    %c0_6 = arith.constant 0 : index
    %c0_7 = arith.constant 0 : index
    %8 = vector.load %arg4[%c0_6, %c0_7] : memref<256x128xf32, #tpu.memory_space<vmem>>, vector<256x128xf32>
    %cst_8 = arith.constant dense<0.000000e+00> : vector<8x128xf32>
    %9 = tpu.matmul %7, %8, %cst_8 {dimension_numbers = #tpu.dot_dimension_numbers<[1], [0], [0], [1], [0, 0, 1, 1], [], []>} : vector<8x256xf32>, vector<256x128xf32>, vector<8x128xf32> -> vector<8x128xf32>
    %c0_9 = arith.constant 0 : index
    %c0_10 = arith.constant 0 : index
    %10 = vector.load %arg5[%c0_9, %c0_10] : memref<1x128xf32, #tpu.memory_space<vmem>>, vector<1x128xf32>
    %11 = vector.broadcast %10 : vector<1x128xf32> to vector<8x128xf32>
    %12 = arith.addf %9, %11 : vector<8x128xf32>
    %cst_11 = arith.constant 0.000000e+00 : f32
    %13 = vector.broadcast %cst_11 : f32 to vector<8x128xf32>
    %14 = arith.maximumf %12, %13 : vector<8x128xf32>
    %c0_12 = arith.constant 0 : index
    %c0_13 = arith.constant 0 : index
    %15 = vector.load %arg6[%c0_12, %c0_13] : memref<128x128xf32, #tpu.memory_space<vmem>>, vector<128x128xf32>
    %cst_14 = arith.constant dense<0.000000e+00> : vector<8x128xf32>
    %16 = tpu.matmul %14, %15, %cst_14 {dimension_numbers = #tpu.dot_dimension_numbers<[1], [0], [0], [1], [0, 0, 1, 1], [], []>} : vector<8x128xf32>, vector<128x128xf32>, vector<8x128xf32> -> vector<8x128xf32>
    %c0_15 = arith.constant 0 : index
    %c0_16 = arith.constant 0 : index
    %17 = vector.load %arg7[%c0_15, %c0_16] : memref<1x128xf32, #tpu.memory_space<vmem>>, vector<1x128xf32>
    %18 = vector.broadcast %17 : vector<1x128xf32> to vector<8x128xf32>
    %19 = arith.addf %16, %18 : vector<8x128xf32>
    %cst_17 = arith.constant dense<0xFF800000> : vector<8xf32>
    %20 = vector.multi_reduction <maximumf>, %19, %cst_17 [1] : vector<8x128xf32> to vector<8xf32>
    %21 = vector.shape_cast %20 : vector<8xf32> to vector<8x1xf32>
    %22 = vector.broadcast %21 : vector<8x1xf32> to vector<8x128xf32>
    %23 = arith.subf %19, %22 : vector<8x128xf32>
    %24 = math.exp %23 : vector<8x128xf32>
    %cst_18 = arith.constant dense<0.000000e+00> : vector<8xf32>
    %25 = vector.multi_reduction <add>, %24, %cst_18 [1] : vector<8x128xf32> to vector<8xf32>
    %26 = vector.shape_cast %25 : vector<8xf32> to vector<8x1xf32>
    %27 = tpu.reciprocal %26 : vector<8x1xf32> -> vector<8x1xf32>
    %28 = vector.broadcast %27 : vector<8x1xf32> to vector<8x128xf32>
    %29 = arith.mulf %24, %28 : vector<8x128xf32>
    %c0_19 = arith.constant 0 : index
    %c0_20 = arith.constant 0 : index
    %30 = vector.load %arg8[%c0_19, %c0_20] : memref<8x128xf32, #tpu.memory_space<vmem>>, vector<8x128xf32>
    tpu.vector_store %arg8[%c0_19, %c0_20], %29 {strides = array<i32>} : memref<8x128xf32, #tpu.memory_space<vmem>>, vector<8x128xf32>,
    return
  }
  func.func @transform_0(%arg0: i32) -> (i32, i32) {
    %c0_i32 = arith.constant 0 : i32
    %c0_i32_0 = arith.constant 0 : i32
    return %arg0, %c0_i32 : i32, i32
  }
  func.func @transform_1(%arg0: i32) -> (i32, i32) {
    %c0_i32 = arith.constant 0 : i32
    %c0_i32_0 = arith.constant 0 : i32
    %c0_i32_1 = arith.constant 0 : i32
    return %c0_i32, %c0_i32_0 : i32, i32
  }
  func.func @transform_2(%arg0: i32) -> (i32, i32) {
    %c0_i32 = arith.constant 0 : i32
    %c0_i32_0 = arith.constant 0 : i32
    %c0_i32_1 = arith.constant 0 : i32
    return %c0_i32, %c0_i32_0 : i32, i32
  }
  func.func @transform_3(%arg0: i32) -> (i32, i32) {
    %c0_i32 = arith.constant 0 : i32
    %c0_i32_0 = arith.constant 0 : i32
    %c0_i32_1 = arith.constant 0 : i32
    return %c0_i32, %c0_i32_0 : i32, i32
  }
  func.func @transform_4(%arg0: i32) -> (i32, i32) {
    %c0_i32 = arith.constant 0 : i32
    %c0_i32_0 = arith.constant 0 : i32
    %c0_i32_1 = arith.constant 0 : i32
    return %c0_i32, %c0_i32_0 : i32, i32
  }
  func.func @transform_5(%arg0: i32) -> (i32, i32) {
    %c0_i32 = arith.constant 0 : i32
    %c0_i32_0 = arith.constant 0 : i32
    %c0_i32_1 = arith.constant 0 : i32
    return %c0_i32, %c0_i32_0 : i32, i32
  }
  func.func @transform_6(%arg0: i32) -> (i32, i32) {
    %c0_i32 = arith.constant 0 : i32
    %c0_i32_0 = arith.constant 0 : i32
    %c0_i32_1 = arith.constant 0 : i32
    return %c0_i32, %c0_i32_0 : i32, i32
  }
  func.func @transform_7(%arg0: i32) -> (i32, i32) {
    %c0_i32 = arith.constant 0 : i32
    %c0_i32_0 = arith.constant 0 : i32
    return %arg0, %c0_i32 : i32, i32
  }
}

</mosaic_0001>

<bundles_post_ra>
// kernel: tpu_custom_call.1
= control target key start
LH: loop header
LB: loop body
LE: loop exit
PB: predicated region body
PF: predicated region fallthrough
CT: control target
= control target key end

     0   :  { %12 = vsyncpa [#allocation3], 0  ;;  %s583_s0 = inlined_call_operand.hbm [shape: f32[8,128], index: 0, kind: input, shape index: {}]   ;;  %s584_s1 = inlined_call_operand.hbm [shape: f32[128,256], index: 1, kind: input, shape index: {}]   ;;  %s585_s2 = inlined_call_operand.hbm [shape: f32[1,256], index: 2, kind: input, shape index: {}]   ;;  %s586_s3 = inlined_call_operand.hbm [shape: f32[256,128], index: 3, kind: input, shape index: {}]   ;;  %s587_s4 = inlined_call_operand.vmem [shape: f32[1,128], index: 4, kind: input, shape index: {}]   ;;  %s588_s5 = inlined_call_operand.hbm [shape: f32[128,128], index: 5, kind: input, shape index: {}]   ;;  %s589_s6 = inlined_call_operand.vmem [shape: f32[1,128], index: 6, kind: input, shape index: {}]   ;;  %s590_s7 = inlined_call_operand.hbm [shape: f32[8,128], index: 7, kind: output, shape index: {}]  }
   0x1   :  { %13 = vsyncpa [#allocation6], 0 }
   0x2   :  { %14 = vsyncpa [#allocation9], 0  ;;  %s31_s26 = sshll.u32 %s584_s1, 4  ;;  %s32_s26 = int_to_ptr.hbm [resolvable:$true] %s31_s26 }
   0x3   :  { %15 = vsyncpa [#allocation4], 0  ;;  %s509_s27 = smov [#allocation5]   ;;  %s55_s8 = sshll.u32 %s586_s3, 4  ;;  %s56_s8 = int_to_ptr.hbm [resolvable:$true] %s55_s8 }
   0x4   :  { %s33_s28 = sshll.u32 %s509_s27, 4  ;;  %s510_s9 = smov 256   ;;  %s34_s28 = int_to_ptr.vmem [resolvable:$true] %s33_s28 }
   0x5   :  { %s511_s10 = smov 16   ;;  %s512_s11 = smov [#allocation8]  }
   0x6   :  { %39 = dma.hbm_to_vmem [thread:$0]  %s32_s26, 4096, %s34_s28, [#allocation6], %s510_s9, %s510_s9, %s511_s10  }
   0x7   :  { %s57_s12 = sshll.u32 %s512_s11, 4  ;;  %s513_s13 = smov 128   ;;  %s58_s12 = int_to_ptr.vmem [resolvable:$true] %s57_s12 }
   0x8   :  { %s514_s14 = smov 8   ;;  %s21_s16 = sshll.u32 %s583_s0, 4  ;;  %s22_s16 = int_to_ptr.hbm [resolvable:$true] %s21_s16 }
   0x9   :  { %63 = dma.hbm_to_vmem [thread:$0]  %s56_s8, 4096, %s58_s12, [#allocation9], %s513_s13, %s513_s13, %s514_s14  }
   0xa   :  { %s515_s17 = smov [#allocation2]   ;;  %s45_s20 = sshll.u32 %s585_s2, 4  ;;  %s46_s20 = int_to_ptr.hbm [resolvable:$true] %s45_s20 }
   0xb   :  { %s23_s18 = sshll.u32 %s515_s17, 4  ;;  %s516_s21 = smov [#allocation7]   ;;  %s24_s18 = int_to_ptr.vmem [resolvable:$true] %s23_s18 }
   0xc   :  { %26 = dma.hbm_to_vmem [thread:$0]  %s22_s16, 128, %s24_s18, [#allocation3]  }
   0xd   :  { %s47_s22 = sshll.u32 %s516_s21, 4  ;;  %s70_s25 = sshll.u32 %s588_s5, 4  ;;  %s48_s22 = int_to_ptr.vmem [resolvable:$true] %s47_s22  ;;  %s71_s25 = int_to_ptr.hbm [resolvable:$true] %s70_s25 }
   0xe   :  { %50 = dma.hbm_to_vmem [thread:$0]  %s46_s20, 32, %s48_s22, [#allocation6]  }
   0xf   :  { %s517_s0 = smov [#allocation10]  }
  0x10   :  { %s72_s26 = sshll.u32 %s517_s0, 4  ;;  %s73_s26 = int_to_ptr.vmem [resolvable:$true] %s72_s26 }
  0x11   :  { %78 = dma.hbm_to_vmem [thread:$0]  %s71_s25, 2048, %s73_s26, [#allocation9], %s513_s13, %s513_s13, %s514_s14  }
  0x12   :  { %501 = dma.done.wait [#allocation3], 128  }
  0x13   :  { %502 = vsyncadd [#allocation3], 4294967168 }
  0x14   :  { %503 = dma.done.wait [#allocation6], 4128  }
  0x15   :  { %504 = vsyncadd [#allocation6], 4294963168 }
  0x16   :  { %505 = dma.done.wait [#allocation9], 6144  }
  0x17   :  { %506 = vsyncadd [#allocation9], 4294961152  ;;  %v132_v0 = vld [vmem:[#allocation5 + $0xf0] sm:$0xff]  ;;  %v130_v1 = vld [vmem:[#allocation5 + $0xe0] sm:$0xff]  ;;  %s329_s8 = sshll.u32 %s590_s7, 4  ;;  %s330_s8 = int_to_ptr.hbm [resolvable:$true] %s329_s8 }
  0x18   :  { %v133_v2 = vld [vmem:[#allocation5 + $0xf8] sm:$0xff]  ;;  %140 = vmatpush.msra.mxu0 %v132_v0  ;;  %v131_v3 = vld [vmem:[#allocation5 + $0xe8] sm:$0xff]  ;;  %v128_v4 = vld [vmem:[#allocation5 + $0xd0] sm:$0xff] }
  0x19   :  { %160 = vmatpush.msra.mxu1 %v133_v2  ;;  %v129_v5 = vld [vmem:[#allocation5 + $0xd8] sm:$0xff]  ;;  %v126_v6 = vld [vmem:[#allocation5 + $0xc0] sm:$0xff]  ;;  %v127_v7 = vld [vmem:[#allocation5 + $0xc8] sm:$0xff] }
  0x1a   :  { %141 = vmatpush.msra.mxu0 %v130_v1  ;;  %v124_v8 = vld [vmem:[#allocation5 + $0xb0] sm:$0xff]  ;;  %v125_v9 = vld [vmem:[#allocation5 + $0xb8] sm:$0xff]  ;;  %v122_v10 = vld [vmem:[#allocation5 + $0xa0] sm:$0xff] }
  0x1b   :  { %161 = vmatpush.msra.mxu1 %v131_v3  ;;  %v123_v11 = vld [vmem:[#allocation5 + $0xa8] sm:$0xff]  ;;  %v120_v12 = vld [vmem:[#allocation5 + $0x90] sm:$0xff]  ;;  %v121_v13 = vld [vmem:[#allocation5 + $0x98] sm:$0xff] }
  0x1c   :  { %142 = vmatpush.msra.mxu0 %v128_v4  ;;  %v197_v14 = vld [vmem:[#allocation8 + $0x78] sm:$0xff]  ;;  %v196_v15 = vld [vmem:[#allocation8 + $0x70] sm:$0xff]  ;;  %v119_v18 = vld [vmem:[#allocation5 + $0x88] sm:$0xff] }
  0x1d   :  { %162 = vmatpush.msra.mxu1 %v129_v5  ;;  %v213_v16 = vld [vmem:[#allocation8 + $0xf8] sm:$0xff]  ;;  %218 = vmatpush.msra.mxu2 %v197_v14  ;;  %v212_v19 = vld [vmem:[#allocation8 + $0xf0] sm:$0xff]  ;;  %v195_v20 = vld [vmem:[#allocation8 + $0x68] sm:$0xff] }
  0x1e   :  { %143 = vmatpush.msra.mxu0 %v126_v6  ;;  %v118_v17 = vld [vmem:[#allocation5 + $0x80] sm:$0xff]  ;;  %238 = vmatpush.msra.mxu3 %v213_v16  ;;  %v211_v21 = vld [vmem:[#allocation8 + $0xe8] sm:$0xff]  ;;  %v117_v23 = vld [vmem:[#allocation5 + $0x78] sm:$0xff] }
  0x1f   :  { %163 = vmatpush.msra.mxu1 %v127_v7  ;;  %v116_v22 = vld [vmem:[#allocation5 + $0x70] sm:$0xff]  ;;  %219 = vmatpush.msra.mxu2 %v196_v15  ;;  %v194_v24 = vld [vmem:[#allocation8 + $0x60] sm:$0xff]  ;;  %v193_v28 = vld [vmem:[#allocation8 + $0x58] sm:$0xff] }
  0x20   :  { %144 = vmatpush.msra.mxu0 %v124_v8  ;;  %239 = vmatpush.msra.mxu3 %v212_v19  ;;  %v210_v25 = vld [vmem:[#allocation8 + $0xe0] sm:$0xff]  ;;  %v209_v29 = vld [vmem:[#allocation8 + $0xd8] sm:$0xff]  ;;  %v112_v30 = vld [vmem:[#allocation5 + $0x50] sm:$0xff] }
  0x21   :  { %164 = vmatpush.msra.mxu1 %v125_v9  ;;  %v114_v26 = vld [vmem:[#allocation5 + $0x60] sm:$0xff]  ;;  %v115_v27 = vld [vmem:[#allocation5 + $0x68] sm:$0xff]  ;;  %220 = vmatpush.msra.mxu2 %v195_v20  ;;  %v113_v31 = vld [vmem:[#allocation5 + $0x58] sm:$0xff] }
  0x22   :  { %145 = vmatpush.msra.mxu0 %v122_v10  ;;  %240 = vmatpush.msra.mxu3 %v211_v21  ;;  %v192_v32 = vld [vmem:[#allocation8 + $0x50] sm:$0xff]  ;;  %v110_v34 = vld [vmem:[#allocation5 + $0x40] sm:$0xff]  ;;  %v111_v35 = vld [vmem:[#allocation5 + $0x48] sm:$0xff] }
  0x23   :  { %165 = vmatpush.msra.mxu1 %v123_v11  ;;  %221 = vmatpush.msra.mxu2 %v194_v24  ;;  %v208_v33 = vld [vmem:[#allocation8 + $0xd0] sm:$0xff]  ;;  %v191_v36 = vld [vmem:[#allocation8 + $0x48] sm:$0xff]  ;;  %v190_v40 = vld [vmem:[#allocation8 + $0x40] sm:$0xff] }
  0x24   :  { %146 = vmatpush.msra.mxu0 %v120_v12  ;;  %241 = vmatpush.msra.mxu3 %v210_v25  ;;  %v207_v37 = vld [vmem:[#allocation8 + $0xc8] sm:$0xff]  ;;  %v109_v39 = vld [vmem:[#allocation5 + $0x38] sm:$0xff]  ;;  %v206_v41 = vld [vmem:[#allocation8 + $0xc0] sm:$0xff] }
  0x25   :  { %166 = vmatpush.msra.mxu1 %v121_v13  ;;  %222 = vmatpush.msra.mxu2 %v193_v28  ;;  %v108_v38 = vld [vmem:[#allocation5 + $0x30] sm:$0xff]  ;;  %v106_v42 = vld [vmem:[#allocation5 + $0x20] sm:$0xff]  ;;  %v107_v43 = vld [vmem:[#allocation5 + $0x28] sm:$0xff] }
  0x26   :  { %147 = vmatpush.msra.mxu0 %v118_v17  ;;  %242 = vmatpush.msra.mxu3 %v209_v29  ;;  %v189_v44 = vld [vmem:[#allocation8 + $0x38] sm:$0xff]  ;;  %v104_v46 = vld [vmem:[#allocation5 + $0x10] sm:$0xff]  ;;  %v103_v51 = vld [vmem:[#allocation5 + $0x8] sm:$0xff] }
  0x27   :  { %167 = vmatpush.msra.mxu1 %v119_v18  ;;  %223 = vmatpush.msra.mxu2 %v192_v32  ;;  %v205_v45 = vld [vmem:[#allocation8 + $0xb8] sm:$0xff]  ;;  %v188_v48 = vld [vmem:[#allocation8 + $0x30] sm:$0xff]  ;;  %v187_v53 = vld [vmem:[#allocation8 + $0x28] sm:$0xff] }
  0x28   :  { %148 = vmatpush.msra.mxu0 %v116_v22  ;;  %243 = vmatpush.msra.mxu3 %v208_v33  ;;  %v105_v47 = vld [vmem:[#allocation5 + $0x18] sm:$0xff]  ;;  %v102_v50 = vld [vmem:[#allocation5] sm:$0xff]  ;;  %v203_v54 = vld [vmem:[#allocation8 + $0xa8] sm:$0xff] }
  0x29   :  { %168 = vmatpush.msra.mxu1 %v117_v23  ;;  %224 = vmatpush.msra.mxu2 %v191_v36  ;;  %v204_v49 = vld [vmem:[#allocation8 + $0xb0] sm:$0xff]  ;;  %v186_v55 = vld [vmem:[#allocation8 + $0x20] sm:$0xff]  ;;  %v185_v57 = vld [vmem:[#allocation8 + $0x18] sm:$0xff] }
  0x2a   :  { %149 = vmatpush.msra.mxu0 %v114_v26  ;;  %244 = vmatpush.msra.mxu3 %v207_v37  ;;  %v101_v52 = vld [vmem:[#allocation2] sm:$0xff]  ;;  %v202_v56 = vld [vmem:[#allocation8 + $0xa0] sm:$0xff]  ;;  %v183_v60 = vld [vmem:[#allocation8 + $0x8] sm:$0xff] }
  0x2b   :  { %169 = vmatpush.msra.mxu1 %v115_v27  ;;  %225 = vmatpush.msra.mxu2 %v190_v40  ;;  %v184_v58 = vld [vmem:[#allocation8 + $0x10] sm:$0xff]  ;;  %v201_v59 = vld [vmem:[#allocation8 + $0x98] sm:$0xff]  ;;  %v182_v62 = vld [vmem:[#allocation8] sm:$0xff] }
  0x2c   :  { %150 = vmatpush.msra.mxu0 %v112_v30  ;;  %245 = vmatpush.msra.mxu3 %v206_v41  ;;  %v200_v61 = vld [vmem:[#allocation8 + $0x90] sm:$0xff]  ;;  %v199_v63 = vld [vmem:[#allocation8 + $0x88] sm:$0xff]  ;;  %v198_v0 = vld [vmem:[#allocation8 + $0x80] sm:$0xff] }
  0x2d   :  { %170 = vmatpush.msra.mxu1 %v113_v31  ;;  %226 = vmatpush.msra.mxu2 %v189_v44  ;;  %v274_v1 = vld [vmem:[#allocation10 + $0x78] sm:$0xff]  ;;  %v273_v2 = vld [vmem:[#allocation10 + $0x70] sm:$0xff]  ;;  %v272_v3 = vld [vmem:[#allocation10 + $0x68] sm:$0xff] }
  0x2e   :  { %151 = vmatpush.msra.mxu0 %v110_v34  ;;  %246 = vmatpush.msra.mxu3 %v205_v45  ;;  %v271_v4 = vld [vmem:[#allocation10 + $0x60] sm:$0xff]  ;;  %v270_v5 = vld [vmem:[#allocation10 + $0x58] sm:$0xff]  ;;  %v269_v6 = vld [vmem:[#allocation10 + $0x50] sm:$0xff] }
  0x2f   :  { %171 = vmatpush.msra.mxu1 %v111_v35  ;;  %227 = vmatpush.msra.mxu2 %v188_v48  ;;  %v268_v7 = vld [vmem:[#allocation10 + $0x48] sm:$0xff]  ;;  %v267_v8 = vld [vmem:[#allocation10 + $0x40] sm:$0xff]  ;;  %v266_v9 = vld [vmem:[#allocation10 + $0x38] sm:$0xff] }
  0x30   :  { %152 = vmatpush.msra.mxu0 %v108_v38  ;;  %247 = vmatpush.msra.mxu3 %v204_v49  ;;  %v265_v10 = vld [vmem:[#allocation10 + $0x30] sm:$0xff]  ;;  %v264_v11 = vld [vmem:[#allocation10 + $0x28] sm:$0xff]  ;;  %v263_v12 = vld [vmem:[#allocation10 + $0x20] sm:$0xff] }
  0x31   :  { %172 = vmatpush.msra.mxu1 %v109_v39  ;;  %228 = vmatpush.msra.mxu2 %v187_v53  ;;  %v134_v13 = vld [vmem:[#allocation7] sm:$0x3]  ;;  %v261_v23 = vld [vmem:[#allocation10 + $0x10] sm:$0xff]  ;;  %v260_v24 = vld [vmem:[#allocation10 + $0x8] sm:$0xff] }
  0x32   :  { %153 = vmatpush.msra.mxu0 %v106_v42  ;;  %248 = vmatpush.msra.mxu3 %v203_v54  ;;  %v136_v14 = vperm.slane %v134_v13, 0  ;;  %v137_v15 = vperm.slane %v134_v13, 1  ;;  %v262_v22 = vld [vmem:[#allocation10 + $0x18] sm:$0xff]  ;;  %v259_v25 = vld [vmem:[#allocation10] sm:$0xff]  ;;  %v351_v26 = vld [vmem:[%s587_s4] ss:$0 sm:$0xff] }
  0x33   :  { %173 = vmatpush.msra.mxu1 %v107_v43  ;;  %229 = vmatpush.msra.mxu2 %v186_v55  ;;  %v352_v32 = vld [vmem:[%s589_s6] ss:$0 sm:$0xff]  ;;  %s518_s4 = smov [#allocation11]  }
  0x34   :  { %154 = vmatpush.msra.mxu0 %v104_v46  ;;  %249 = vmatpush.msra.mxu3 %v202_v56  ;;  %s327_s6 = sshll.u32 %s518_s4, 4  ;;  %s328_s6 = int_to_ptr.vmem [resolvable:$true] %s327_s6 }
  0x35   :  { %174 = vmatpush.msra.mxu1 %v105_v47  ;;  %230 = vmatpush.msra.mxu2 %v185_v57 }
  0x36   :  { %155 = vmatpush.msra.mxu0 %v102_v50  ;;  %250 = vmatpush.msra.mxu3 %v201_v59 }
  0x37   :  { %175 = vmatpush.msra.mxu1 %v103_v51  ;;  %156 = vmatmul.f32.vlgmr.msra.gmra.mxu0 %v101_v52 }
  0x38   :  { %176 = vmatmul.f32.vlgmr.msra.gmra.mxu1 %v101_v52  ;;  %231 = vmatpush.msra.mxu2 %v184_v58 }
  0x39   :  { %251 = vmatpush.msra.mxu3 %v200_v61  ;;  %279 = vmatpush.msrb.mxu0 %v274_v1 }
  0x3a   :  { %232 = vmatpush.msra.mxu2 %v183_v60 }
  0x3b   :  { %252 = vmatpush.msra.mxu3 %v199_v63  ;;  %280 = vmatpush.msrb.mxu0 %v273_v2 }
  0x3c   :  { %233 = vmatpush.msra.mxu2 %v182_v62 }
  0x3d   :  { %253 = vmatpush.msra.mxu3 %v198_v0  ;;  %281 = vmatpush.msrb.mxu0 %v272_v3 }
  0x3f   :  { %282 = vmatpush.msrb.mxu0 %v271_v4 }
  0x41   :  { %283 = vmatpush.msrb.mxu0 %v270_v5 }
  0x43   :  { %284 = vmatpush.msrb.mxu0 %v269_v6 }
  0x45   :  { %285 = vmatpush.msrb.mxu0 %v268_v7 }
  0x47   :  { %286 = vmatpush.msrb.mxu0 %v267_v8 }
  0x49   :  { %287 = vmatpush.msrb.mxu0 %v266_v9 }
  0x4b   :  { %288 = vmatpush.msrb.mxu0 %v265_v10 }
  0x4d   :  { %289 = vmatpush.msrb.mxu0 %v264_v11 }
  0x4f   :  { %290 = vmatpush.msrb.mxu0 %v263_v12 }
  0x51   :  { %291 = vmatpush.msrb.mxu0 %v262_v22 }
  0x53   :  { %292 = vmatpush.msrb.mxu0 %v261_v23 }
  0x55   :  { %293 = vmatpush.msrb.mxu0 %v260_v24 }
  0x57   :  { %294 = vmatpush.msrb.mxu0 %v259_v25 }
  0xb4   :  { %v157_v16 = vpop.f32.mrf.mxu0 }
  0xb5   :  { %v177_v17 = vpop.f32.mrf.mxu1  ;;  %v158_v18 = vadd.f32 %v157_v16, %v136_v14 }
  0xb6   :  { %v178_v19 = vadd.f32 %v177_v17, %v137_v15 }
  0xb7   :  { %v180_v20 = vmax.f32 %v158_v18, 0.0 }
  0xb8   :  { %v181_v21 = vmax.f32 %v178_v19, 0.0 }
  0xb9   :  { %234 = vmatmul.f32.vlgmr.msra.gmra.mxu2 %v180_v20 }
  0xba   :  { %254 = vmatmul.f32.vlgmr.msra.gmra.mxu3 %v181_v21 }
 0x13c   :  { %v235_v27 = vpop.f32.mrf.mxu2 }
 0x13d   :  { %v255_v28 = vpop.f32.mrf.mxu3  ;;  %v236_v29 = vadd.f32 %v351_v26, %v235_v27 }
 0x13f   :  { %v256_v30 = vadd.f32 %v255_v28, %v236_v29 }
 0x141   :  { %v258_v31 = vmax.f32 %v256_v30, 0.0 }
 0x143   :  { %295 = vmatmul.f32.vlgmr.msrb.gmra.mxu0 %v258_v31 }
 0x1c0   :  { %v296_v33 = vpop.f32.mrf.mxu0 }
 0x1c1   :  { %v297_v34 = vadd.f32 %v352_v32, %v296_v33 }
 0x1c3   :  { %299 = vmax.xlane.f32.xlu0 %v297_v34 }
 0x236   :  { %v300_v35 = vpop.xlane.xlu0 %299 }
 0x237   :  { %v301_v36 = vsub.f32 %v297_v34, %v300_v35 }
 0x239   :  { %v302_v37 = vmul.f32 1.442695, %v301_v36 }
 0x23b   :  { %353 = vpow2.f32 %v302_v37 }
 0x241   :  { %v354_v38 = vpop.eup %353 }
 0x242   :  { %304 = vadd.xlane.f32.xlu0 %v354_v38 }
 0x2b5   :  { %v305_v39 = vpop.xlane.xlu0 %304 }
 0x2b6   :  { %355 = vrcp.f32 %v305_v39  ;;  %v317_v43 = vand.u32 2147483648, %v305_v39  ;;  %v315_v45 = vand.u32 2147483647, %v305_v39  ;;  %vm311_vm1 = vweird.f32 %v305_v39 }
 0x2b8   :  { %v318_v47 = vor.u32 1.1754944e-38, %v317_v43  ;;  %vm316_vm3 = vcmp.eq.f32.partialorder %v315_v45, 8.507059e+37 }
 0x2bc   :  { %v356_v40 = vpop.eup %355 }
 0x2bd   :  { %v307_v41 = vmul.f32 %v356_v40, %v305_v39  ;;  %vm312_vm0 = vweird.f32 %v356_v40 }
 0x2be   :  { %vm313_vm2 = vmor %vm311_vm1, %vm312_vm0 }
 0x2bf   :  { %v308_v42 = vsub.f32 1.0, %v307_v41 }
 0x2c1   :  { %v309_v44 = vmul.f32 %v356_v40, %v308_v42 }
 0x2c3   :  { %v310_v46 = vadd.f32 %v356_v40, %v309_v44 }
 0x2c5   :  { %v314_v48 = vsel %vm313_vm2, %v356_v40, %v310_v46 }
 0x2c6   :  { %v319_v49 = vsel %vm316_vm3, %v318_v47, %v314_v48 }
 0x2c7   :  { %v320_v50 = vmul.f32 %v354_v38, %v319_v49 }
 0x2c9   :  { %321 = vst [vmem:[#allocation11] sm:$0xff] %v320_v50 }
 0x2ca   :  { %332 = dma.vmem_to_hbm [thread:$0]  %s328_s6, 128, %s330_s8, [#allocation4]  }
 0x2cb   :  { %507 = dma.done.wait [#allocation4], 128  }
 0x2cc   :  { %508 = vsyncadd [#allocation4], 4294967168 }
 0x2cd   :  { %337 = vsyncpa [#allocation3], 1 }
 0x2ce   :  { %338 = vsyncpa [#allocation6], 1 }
 0x2cf   :  { %339 = vsyncpa [#allocation9], 1 }
 0x2d0   :  { %340 = vsyncpa [#allocation4], 1 }

</bundles_post_ra>
